<compile_context>
chip_gen: v6e
topology: v6e:2x2x1
jax: 0.10.0
libtpu: 0.0.40
codegen_flags: <defaults>
</compile_context>

<pallas_src>
import jax
import jax.numpy as jnp
from jax.experimental import pallas as pl
from jax.experimental.pallas import tpu as pltpu


def _sigmoid(z):
    # sigmoid(z) == 0.5 * tanh(0.5 * z) + 0.5  -> single EUP instruction, no divide.
    return 0.5 * jnp.tanh(0.5 * z) + 0.5


def ann_kernel(x_ref, w1_ref, b1_ref, w2_ref, b2_ref, w3_ref, b3_ref, o_ref):
    # x_ref: [8, TB] (batch on lanes).  Weights are [out, in], biases [out, 1].
    x = x_ref[...].astype(jnp.float32)

    h1 = _sigmoid(
        jnp.dot(w1_ref[...], x, preferred_element_type=jnp.float32) + b1_ref[...])
    h2 = _sigmoid(
        jnp.dot(w2_ref[...], h1, preferred_element_type=jnp.float32) + b2_ref[...])
    out = _sigmoid(
        jnp.dot(w3_ref[...], h2, preferred_element_type=jnp.float32) + b3_ref[...])

    o_ref[...] = out.astype(o_ref.dtype)


def ann_forward(x, params, *, block_batch=1024, x_dtype=jnp.float32):
    """x: [batch, 8]; params: w{1,2,3} as [out, in], b{1,2,3} as [out, 1].

    Returns [batch, 2] float32.  `x_dtype=jnp.bfloat16` halves input HBM
    traffic (compute and accumulation stay f32 inside the kernel).
    """
    assert block_batch % 128 == 0, "block_batch must be a multiple of 128 (lane dim)"
    w1, b1 = params["w1"], params["b1"]
    w2, b2 = params["w2"], params["b2"]
    w3, b3 = params["w3"], params["b3"]

    batch = x.shape[0]
    n_blocks = pl.cdiv(batch, block_batch)
    padded = n_blocks * block_batch

    # Cheap XLA-side layout plumbing: batch -> lane dimension, optional bf16 DMA.
    xT = x.T.astype(x_dtype)                       # [8, batch]
    if padded != batch:
        xT = jnp.pad(xT, ((0, 0), (0, padded - batch)))

    # Constant index_map => block never changes => DMA'd once, resident in VMEM.
    resident = lambda arr: pl.BlockSpec(arr.shape, lambda i: (0, 0))

    outT = pl.pallas_call(
        ann_kernel,
        out_shape=jax.ShapeDtypeStruct((2, padded), jnp.float32),
        grid=(n_blocks,),
        in_specs=[
            pl.BlockSpec((8, block_batch), lambda i: (0, i)),   # xT tile
            resident(w1), resident(b1),
            resident(w2), resident(b2),
            resident(w3), resident(b3),
        ],
        out_specs=pl.BlockSpec((2, block_batch), lambda i: (0, i)),
        compiler_params=pltpu.CompilerParams(
            dimension_semantics=("parallel",)),
    )(xT, w1, b1, w2, b2, w3, b3)

    return outT[:, :batch].T                        # [batch, 2]


def init_params(key):
    """Mimics nn.Linear default init U(-1/sqrt(fan_in), 1/sqrt(fan_in)).
    Weights stored [out, in] (PyTorch layout); biases [out, 1]."""
    dims = [(8, 8), (8, 8), (8, 2)]  # (fan_in, fan_out) per layer
    params = {}
    for i, (fan_in, fan_out) in enumerate(dims, start=1):
        key, kw, kb = jax.random.split(key, 3)
        bound = 1.0 / jnp.sqrt(fan_in)
        params[f"w{i}"] = jax.random.uniform(
            kw, (fan_out, fan_in), jnp.float32, minval=-bound, maxval=bound)
        params[f"b{i}"] = jax.random.uniform(
            kb, (fan_out, 1), jnp.float32, minval=-bound, maxval=bound)
    return params


def reference_forward(x, params):
    h = jax.nn.sigmoid(x @ params["w1"].T + params["b1"].T)
    h = jax.nn.sigmoid(h @ params["w2"].T + params["b2"].T)
    return jax.nn.sigmoid(h @ params["w3"].T + params["b3"].T)


if __name__ == "__main__":
    key = jax.random.PRNGKey(0)
    key, kx = jax.random.split(key)

    batch = 300                      # deliberately NOT a multiple of the tile size
    x = jax.random.normal(kx, (batch, 8), jnp.float32)
    params = init_params(key)

    ref = reference_forward(x, params)

    # Full-precision path (default): must match PyTorch semantics tightly.
    out_f32 = jax.block_until_ready(
        ann_forward(x, params, block_batch=256, x_dtype=jnp.float32))
    assert out_f32.shape == (batch, 2)
    assert jnp.allclose(out_f32, ref, atol=1e-5, rtol=1e-5), "f32 path mismatch"

    # bf16-input path (halved input DMA traffic); compute stays f32 in-kernel.
    out_bf16 = jax.block_until_ready(
        ann_forward(x, params, block_batch=256, x_dtype=jnp.bfloat16))
    assert jnp.allclose(out_bf16, ref, atol=2e-2, rtol=2e-2), "bf16 path mismatch"

    print("KERNEL_OK")
</pallas_src>

<mosaic_0001>
module attributes {stable_mosaic.version = 11 : i64} {
  func.func @ann_kernel(%arg0: i32, %arg1: memref<8x256xf32, #tpu.memory_space<vmem>>, %arg2: memref<8x8xf32, #tpu.memory_space<vmem>>, %arg3: memref<8x1xf32, #tpu.memory_space<vmem>>, %arg4: memref<8x8xf32, #tpu.memory_space<vmem>>, %arg5: memref<8x1xf32, #tpu.memory_space<vmem>>, %arg6: memref<2x8xf32, #tpu.memory_space<vmem>>, %arg7: memref<2x1xf32, #tpu.memory_space<vmem>>, %arg8: memref<2x256xf32, #tpu.memory_space<vmem>>) attributes {dimension_semantics = [#tpu.dimension_semantics<parallel>], iteration_bounds = array<i64: 2>, scalar_prefetch = 0 : i64, scratch_operands = 0 : i64, tpu.core_type = #tpu.core_type<tc>, window_params = [{transform_indices = @transform_0, window_bounds = array<i64: 8, 256>}, {pipeline_mode = #tpu.pipeline_mode<synchronous>, transform_indices = @transform_1, window_bounds = array<i64: 8, 8>}, {pipeline_mode = #tpu.pipeline_mode<synchronous>, transform_indices = @transform_2, window_bounds = array<i64: 8, 1>}, {pipeline_mode = #tpu.pipeline_mode<synchronous>, transform_indices = @transform_3, window_bounds = array<i64: 8, 8>}, {pipeline_mode = #tpu.pipeline_mode<synchronous>, transform_indices = @transform_4, window_bounds = array<i64: 8, 1>}, {pipeline_mode = #tpu.pipeline_mode<synchronous>, transform_indices = @transform_5, window_bounds = array<i64: 2, 8>}, {pipeline_mode = #tpu.pipeline_mode<synchronous>, transform_indices = @transform_6, window_bounds = array<i64: 2, 1>}, {transform_indices = @transform_7, window_bounds = array<i64: 2, 256>}]} {
    %c0 = arith.constant 0 : index
    %c0_0 = arith.constant 0 : index
    %0 = vector.load %arg1[%c0, %c0_0] : memref<8x256xf32, #tpu.memory_space<vmem>>, vector<8x256xf32>
    %c0_1 = arith.constant 0 : index
    %c0_2 = arith.constant 0 : index
    %1 = vector.load %arg2[%c0_1, %c0_2] : memref<8x8xf32, #tpu.memory_space<vmem>>, vector<8x8xf32>
    %cst = arith.constant dense<0.000000e+00> : vector<8x256xf32>
    %2 = tpu.matmul %1, %0, %cst {dimension_numbers = #tpu.dot_dimension_numbers<[1], [0], [0], [1], [0, 0, 1, 1], [], []>} : vector<8x8xf32>, vector<8x256xf32>, vector<8x256xf32> -> vector<8x256xf32>
    %c0_3 = arith.constant 0 : index
    %c0_4 = arith.constant 0 : index
    %3 = vector.load %arg3[%c0_3, %c0_4] : memref<8x1xf32, #tpu.memory_space<vmem>>, vector<8x1xf32>
    %4 = vector.broadcast %3 : vector<8x1xf32> to vector<8x256xf32>
    %5 = arith.addf %2, %4 : vector<8x256xf32>
    %cst_5 = arith.constant 5.000000e-01 : f32
    %6 = vector.broadcast %cst_5 : f32 to vector<8x256xf32>
    %7 = arith.mulf %6, %5 : vector<8x256xf32>
    %8 = math.tanh %7 : vector<8x256xf32>
    %cst_6 = arith.constant 5.000000e-01 : f32
    %9 = vector.broadcast %cst_6 : f32 to vector<8x256xf32>
    %10 = arith.mulf %9, %8 : vector<8x256xf32>
    %cst_7 = arith.constant 5.000000e-01 : f32
    %11 = vector.broadcast %cst_7 : f32 to vector<8x256xf32>
    %12 = arith.addf %10, %11 : vector<8x256xf32>
    %c0_8 = arith.constant 0 : index
    %c0_9 = arith.constant 0 : index
    %13 = vector.load %arg4[%c0_8, %c0_9] : memref<8x8xf32, #tpu.memory_space<vmem>>, vector<8x8xf32>
    %cst_10 = arith.constant dense<0.000000e+00> : vector<8x256xf32>
    %14 = tpu.matmul %13, %12, %cst_10 {dimension_numbers = #tpu.dot_dimension_numbers<[1], [0], [0], [1], [0, 0, 1, 1], [], []>} : vector<8x8xf32>, vector<8x256xf32>, vector<8x256xf32> -> vector<8x256xf32>
    %c0_11 = arith.constant 0 : index
    %c0_12 = arith.constant 0 : index
    %15 = vector.load %arg5[%c0_11, %c0_12] : memref<8x1xf32, #tpu.memory_space<vmem>>, vector<8x1xf32>
    %16 = vector.broadcast %15 : vector<8x1xf32> to vector<8x256xf32>
    %17 = arith.addf %14, %16 : vector<8x256xf32>
    %cst_13 = arith.constant 5.000000e-01 : f32
    %18 = vector.broadcast %cst_13 : f32 to vector<8x256xf32>
    %19 = arith.mulf %18, %17 : vector<8x256xf32>
    %20 = math.tanh %19 : vector<8x256xf32>
    %cst_14 = arith.constant 5.000000e-01 : f32
    %21 = vector.broadcast %cst_14 : f32 to vector<8x256xf32>
    %22 = arith.mulf %21, %20 : vector<8x256xf32>
    %cst_15 = arith.constant 5.000000e-01 : f32
    %23 = vector.broadcast %cst_15 : f32 to vector<8x256xf32>
    %24 = arith.addf %22, %23 : vector<8x256xf32>
    %c0_16 = arith.constant 0 : index
    %c0_17 = arith.constant 0 : index
    %25 = vector.load %arg6[%c0_16, %c0_17] : memref<2x8xf32, #tpu.memory_space<vmem>>, vector<2x8xf32>
    %cst_18 = arith.constant dense<0.000000e+00> : vector<2x256xf32>
    %26 = tpu.matmul %25, %24, %cst_18 {dimension_numbers = #tpu.dot_dimension_numbers<[1], [0], [0], [1], [0, 0, 1, 1], [], []>} : vector<2x8xf32>, vector<8x256xf32>, vector<2x256xf32> -> vector<2x256xf32>
    %c0_19 = arith.constant 0 : index
    %c0_20 = arith.constant 0 : index
    %27 = vector.load %arg7[%c0_19, %c0_20] : memref<2x1xf32, #tpu.memory_space<vmem>>, vector<2x1xf32>
    %28 = vector.broadcast %27 : vector<2x1xf32> to vector<2x256xf32>
    %29 = arith.addf %26, %28 : vector<2x256xf32>
    %cst_21 = arith.constant 5.000000e-01 : f32
    %30 = vector.broadcast %cst_21 : f32 to vector<2x256xf32>
    %31 = arith.mulf %30, %29 : vector<2x256xf32>
    %32 = math.tanh %31 : vector<2x256xf32>
    %cst_22 = arith.constant 5.000000e-01 : f32
    %33 = vector.broadcast %cst_22 : f32 to vector<2x256xf32>
    %34 = arith.mulf %33, %32 : vector<2x256xf32>
    %cst_23 = arith.constant 5.000000e-01 : f32
    %35 = vector.broadcast %cst_23 : f32 to vector<2x256xf32>
    %36 = arith.addf %34, %35 : vector<2x256xf32>
    %c0_24 = arith.constant 0 : index
    %c0_25 = arith.constant 0 : index
    %37 = vector.load %arg8[%c0_24, %c0_25] : memref<2x256xf32, #tpu.memory_space<vmem>>, vector<2x256xf32>
    tpu.vector_store %arg8[%c0_24, %c0_25], %36 {strides = array<i32>} : memref<2x256xf32, #tpu.memory_space<vmem>>, vector<2x256xf32>,
    return
  }
  func.func @transform_0(%arg0: i32) -> (i32, i32) {
    %c0_i32 = arith.constant 0 : i32
    %c0_i32_0 = arith.constant 0 : i32
    return %c0_i32, %arg0 : i32, i32
  }
  func.func @transform_1(%arg0: i32) -> (i32, i32) {
    %c0_i32 = arith.constant 0 : i32
    %c0_i32_0 = arith.constant 0 : i32
    %c0_i32_1 = arith.constant 0 : i32
    return %c0_i32, %c0_i32_0 : i32, i32
  }
  func.func @transform_2(%arg0: i32) -> (i32, i32) {
    %c0_i32 = arith.constant 0 : i32
    %c0_i32_0 = arith.constant 0 : i32
    %c0_i32_1 = arith.constant 0 : i32
    return %c0_i32, %c0_i32_0 : i32, i32
  }
  func.func @transform_3(%arg0: i32) -> (i32, i32) {
    %c0_i32 = arith.constant 0 : i32
    %c0_i32_0 = arith.constant 0 : i32
    %c0_i32_1 = arith.constant 0 : i32
    return %c0_i32, %c0_i32_0 : i32, i32
  }
  func.func @transform_4(%arg0: i32) -> (i32, i32) {
    %c0_i32 = arith.constant 0 : i32
    %c0_i32_0 = arith.constant 0 : i32
    %c0_i32_1 = arith.constant 0 : i32
    return %c0_i32, %c0_i32_0 : i32, i32
  }
  func.func @transform_5(%arg0: i32) -> (i32, i32) {
    %c0_i32 = arith.constant 0 : i32
    %c0_i32_0 = arith.constant 0 : i32
    %c0_i32_1 = arith.constant 0 : i32
    return %c0_i32, %c0_i32_0 : i32, i32
  }
  func.func @transform_6(%arg0: i32) -> (i32, i32) {
    %c0_i32 = arith.constant 0 : i32
    %c0_i32_0 = arith.constant 0 : i32
    %c0_i32_1 = arith.constant 0 : i32
    return %c0_i32, %c0_i32_0 : i32, i32
  }
  func.func @transform_7(%arg0: i32) -> (i32, i32) {
    %c0_i32 = arith.constant 0 : i32
    %c0_i32_0 = arith.constant 0 : i32
    return %c0_i32, %arg0 : i32, i32
  }
}

</mosaic_0001>

<bundles_post_ra>
// kernel: tpu_custom_call.1
= control target key start
LH: loop header
LB: loop body
LE: loop exit
PB: predicated region body
PF: predicated region fallthrough
CT: control target
= control target key end

     0   :  { %12 = vsyncpa [#allocation3], 0  ;;  %s1047_s0 = inlined_call_operand.hbm [shape: f32[8,512], index: 0, kind: input, shape index: {}]   ;;  %s1048_s1 = inlined_call_operand.vmem [shape: f32[8,8], index: 1, kind: input, shape index: {}]   ;;  %s1049_s2 = inlined_call_operand.vmem [shape: f32[8,1], index: 2, kind: input, shape index: {}]   ;;  %s1050_s3 = inlined_call_operand.vmem [shape: f32[8,8], index: 3, kind: input, shape index: {}]   ;;  %s1051_s4 = inlined_call_operand.vmem [shape: f32[8,1], index: 4, kind: input, shape index: {}]   ;;  %s1052_s5 = inlined_call_operand.vmem [shape: f32[2,8], index: 5, kind: input, shape index: {}]   ;;  %s1053_s6 = inlined_call_operand.vmem [shape: f32[2,1], index: 6, kind: input, shape index: {}]   ;;  %s1054_s7 = inlined_call_operand.hbm [shape: f32[2,512], index: 7, kind: output, shape index: {}]  }
   0x1   :  { %14 = vsyncpa [#allocation3 + $0x1], 0 }
   0x2   :  { %15 = vsyncpa [#allocation4], 0 }
   0x3   :  { %17 = vsyncpa [#allocation4 + $0x1], 0  ;;  %s884_s24 = smov 0   ;;  %s886_s25 = smov 0  }
   0x4   :  { %s888_s26 = smov 0   ;;  %s890_s27 = smov 0  }
   0x5 LB: > { %s905_s28 = sadd.s32 4294967295, %s838_s27   ;;  %s664_s29 = sadd.s32 4294967294, %s838_s27   ;;  %s838_s27 = sphi %s890_s27, %s1071_s27   ;;  %s834_s26 = sphi %s888_s26, %s1070_s26   ;;  %s830_s25 = sphi %s886_s25, %s1069_s25   ;;  %s826_s24 = sphi %s884_s24, %s1068_s24  }
   0x6   : > { %s909_s30 = sadd.s32 1, %s838_s27   ;;  %s30_s8 = sadd.s32 1, %s834_s26 }
   0x7   : > { %s27_s9 = ssub.s32 %s838_s27, %s909_s30  ;;  %p37_p0 = scmp.ne.s32.totalorder %s834_s26, %s830_s25 }
   0x8   : > { %p28_p1 = scmp.eq.s32.totalorder %s27_s9, 0  ;;  %p38_p2 = scmp.eq.s32.totalorder %s838_s27, 0 }
   0x9   : > { %p43_p3 = scmp.ne.s32.totalorder %s830_s25, %s826_s24  ;;  %p44_p4 = scmp.eq.s32.totalorder %s905_s28, 0 }
   0xa   : > { %s921_s10 = scalar_select %p28_p1, %s834_s26, %s30_s8  }
   0xb   : > { %p923_p5 = por %p38_p2, %p37_p0  ;;  %p927_p6 = por %p44_p4, %p43_p3 }
   0xc   : > { %p193_p7 = scmp.eq.s32.totalorder %s905_s28, 1  ;;  %p199_p8 = scmp.eq.s32.totalorder %s664_s29, 1 }
   0xd   : > { %s1058_s12 = scalar_select %p927_p6, 1, 0 }
   0xe   : > { %p696_p10 = scmp.lt.s32.totalorder %s838_s27, 2  ;;  %p934_p11 = por %p193_p7, %p37_p0 }
   0xf   : > { %p938_p12 = por %p199_p8, %p43_p3  ;;  %s237_s15 = sand.u32 1, %s834_s26  }
  0x10   : > { %s1059_s13 = scalar_select %p934_p11, 1, 0 }
  0x11   : > { %s1060_s14 = scalar_select %p938_p12, 1, 0 }
  0x12   : > { %s682_s16 = sshll.u32 %s838_s27, 8  ;;  %s667_s17 = sshll.u32 %s237_s15, 4 }
  0x13   : > { %s947_s20 = scalar_lea.hbm %s1047_s0, %s682_s16  ;;  %s241_s21 = scalar_lea.vmem [#allocation2], %s667_s17 }
  0x14   : > { %s249_s22 = sshll.u32 %s241_s21, 4  ;;  %p951_p13 = pnand %p696_p10, %p923_p5  ;;  %s955_s22 = int_to_ptr.vmem [resolvable:$true] %s249_s22 }
  0x15   : > { %s238_s29 = scalar_lea.sflag [#allocation3], %s237_s15  ;;  %s746_s8 = scalar_lea.hbm %s947_s20, 256 }
  0x16   : > { %p747_p2 = scmp.ne.s32.totalorder %s947_s20, %s746_s8  ;;  %p748_p3 = pneg %p951_p13 }
  0x17   : > { %s751_s11 = scalar_lea.hbm %s1047_s0, 512  ;;  %p752_p5 = scmp.lt.s32.totalorder %s947_s20, %s1047_s0 }
  0x18   : > { %p749_p4 = pnand %p748_p3, %p747_p2  ;;  %p753_p8 = scmp.lt.s32.totalorder %s751_s11, %s746_s8 }
  0x1a   : > { %p750_p7 = pneg %p749_p4  ;;  %p754_p10 = por %p753_p8, %p752_p5 }
  0x1c   : > { %p755_p9 = pnand %p754_p10, %p750_p7 }
  0x1e   : > { %758 = shalt.err (!%p755_p9)
}
  0x1f   : > { %s759_s15 = scalar_lea.vmem %s955_s22, 256  ;;  %s840_s19 = smov [#allocation2]  }
  0x20   : > { %p760_p0 = scmp.ne.s32.totalorder %s955_s22, %s759_s15  ;;  %s764_s21 = sshll.u32 %s840_s19, 4  ;;  %s765_s21 = int_to_ptr.vmem [resolvable:$false] %s764_s21 }
  0x21   : > { %s766_s9 = scalar_lea.vmem %s765_s21, 512  ;;  %p767_p4 = scmp.lt.s32.totalorder %s955_s22, %s765_s21 }
  0x22   : > { %p762_p1 = pnand %p760_p0, %p748_p3  ;;  %p768_p12 = scmp.lt.s32.totalorder %s766_s9, %s759_s15 }
  0x24   : > { %p763_p2 = pneg %p762_p1  ;;  %p769_p11 = por %p768_p12, %p767_p4 }
  0x26   : > { %p770_p6 = pnand %p769_p11, %p763_p2 }
  0x28   : > { %773 = shalt.err (!%p770_p6)
}
  0x29   : > { %691 = dma.hbm_to_vmem [thread:$0]  (!%p951_p13), %s947_s20, 256, %s955_s22, %s238_s29  }
  0x2a   : > { %p1062_p9 = scmp.lt.s32.totalorder %s838_s27, 3  ;;  %p1063_p7 = scmp.ge.s32.totalorder %s838_s27, 1 }
  0x2c   : > { %p255_p0 = pnand %p1063_p7, %p1062_p9 }
  0x2d   : > { %s982_s8 = sand.u32 (!%p255_p0), 1, %s830_s25   ;;  %p1064_p6 = scmp.ne.s32.totalorder (!%p255_p0), %s1058_s12, 0 }
  0x2e   : > { %258 = sbr.rel (%p255_p0) target bundleno = 727 (0x2d7), region = 48  ;;  %s671_s16 = sshll.u32 (!%p255_p0), %s982_s8, 4 }
  0x2f   : > { %s261_s11 = scalar_lea.sflag (!%p255_p0), [#allocation3], %s982_s8  ;;  %s264_s17 = scalar_lea.vmem (!%p255_p0), [#allocation2], %s671_s16 }
  0x33   : > { %817 = dma.done.wait (%p1064_p6), %s261_s11, 256  }
  0x34   : > { %819 = vsyncadd (%p1064_p6), %s261_s11, 4294967040  ;;  %v841_v0 = vmov 0.0   ;;  %v842_v1 = vmov 0   ;;  %v298_v2 = vld [vmem:[%s264_s17 + $0x8] sm:$0xff]  ;;  %v297_v3 = vld [vmem:[%s264_s17] sm:$0xff]  ;;  %vm306_vm0 = vcmask 64512  }
  0x35   : > { %374 = vmatprep.mubr.f32.mxu0 %v841_v0  ;;  %732 = vset.pattern.permute.xlu0 %v842_v1  ;;  %v299_v4 = vld [vmem:[%s1048_s1] sm:$0xff]  ;;  %s672_s17 = sshll.u32 %s982_s8, 2  ;;  %s683_s20 = sshll.u32 %s905_s28, 6 }
  0x36   : > { %463 = vmatprep.mubr.f32.mxu1 %v841_v0  ;;  %733 = vset.pattern.permute.xlu1 %v842_v1  ;;  %v300_v5 = vld [vmem:[%s1049_s2] sm:$0xff]  ;;  %s294_s22 = scalar_lea.vmem [#allocation5], %s672_s17  ;;  %s592_s18 = scalar_lea.hbm %s1054_s7, %s683_s20 }
  0x37   : > { %340 = vmatprep.subr.mxu0 %v298_v2  ;;  %303 = vperm.xlu0 %732, %v300_v5   ;;  %v390_v6 = vld [vmem:[%s1051_s4] sm:$0xff]  ;;  %s594_s23 = sshll.u32 %s294_s22, 4  ;;  %s580_s15 = scalar_lea.sflag [#allocation4], %s982_s8  ;;  %s595_s23 = int_to_ptr.vmem [resolvable:$true] %s594_s23 }
  0x38   : > { %341 = vmatpush1.msra.mxu0 %v297_v3  ;;  %v389_v20 = vld [vmem:[%s1050_s3] sm:$0xff]  ;;  %s774_s19 = scalar_lea.vmem %s595_s23, 64  ;;  %p1065_p12 = scmp.ne.s32.totalorder %s1059_s13, 0 }
  0x39   : > { %673 = vmatmul.mubr.msk.f32.vlgmr.msra.gmra.mxu0 %vm306_vm0, %v299_v4  ;;  %v479_v21 = vld [vmem:[%s1053_s6] sm:$0x3]  ;;  %p775_p11 = scmp.ne.s32.totalorder %s595_s23, %s774_s19  ;;  %s843_s21 = smov [#allocation5]  }
  0x3a   : > { %552 = vmatprep.mubr.f32.mxu0 %v841_v0  ;;  %482 = vperm.xlu1 %733, %v479_v21   ;;  %v478_v35 = vld [vmem:[%s1052_s5] sm:$0x3]  ;;  %s778_s9 = sshll.u32 %s843_s21, 4  ;;  %s779_s9 = int_to_ptr.vmem [resolvable:$false] %s778_s9 }
  0x3b   : > { %393 = vperm.xlu0 %732, %v390_v6   ;;  %p776_p13 = pnand %p775_p11, %p1065_p12  ;;  %s780_s28 = scalar_lea.vmem %s779_s9, 128 }
  0x3c   : > { %p781_p3 = scmp.lt.s32.totalorder %s595_s23, %s779_s9  ;;  %p782_p5 = scmp.lt.s32.totalorder %s780_s28, %s774_s19 }
  0x3d   : > { %p777_p1 = pneg %p776_p13 }
  0x3e   : > { %p783_p8 = por %p782_p5, %p781_p3 }
  0x40   : > { %p784_p10 = pnand %p783_p8, %p777_p1 }
  0xb2   : > { %v304_v7 = vpop.permute.xlu0 %303 }
  0xb5   : > { %v483_v36 = vpop.permute.xlu1 %482 }
  0xb6   : > { %v394_v22 = vpop.permute.xlu0 %393 }
  0xf9   : > { %v376_v8 = vpop.f32.mrf.mxu0 }
  0xfa   : > { %v377_v9 = vadd.f32 %v376_v8, %v304_v7 }
  0xfb   : > { %v378_v10 = vpop.f32.mrf.mxu0 }
  0xfc   : > { %v381_v11 = vmul.f32 0.5, %v377_v9  ;;  %v379_v12 = vadd.f32 %v378_v10, %v304_v7 }
  0xfe   : > { %734 = vtanh.f32 %v381_v11  ;;  %v382_v13 = vmul.f32 0.5, %v379_v12 }
 0x100   : > { %736 = vtanh.f32 %v382_v13 }
 0x10b   : > { %v735_v14 = vpop.eup %734 }
 0x10c   : > { %v385_v16 = vmul.f32 0.5, %v735_v14 }
 0x10d   : > { %v737_v15 = vpop.eup %736 }
 0x10e   : > { %v386_v17 = vmul.f32 0.5, %v737_v15  ;;  %v387_v19 = vadd.f32 0.5, %v385_v16 }
 0x110   : > { %v388_v18 = vadd.f32 0.5, %v386_v17 }
 0x112   : > { %429 = vmatprep.subr.mxu1 %v388_v18 }
 0x113   : > { %430 = vmatpush1.msra.mxu1 %v387_v19 }
 0x114   : > { %674 = vmatmul.mubr.msk.f32.vlgmr.msra.gmra.mxu1 %vm306_vm0, %v389_v20 }
 0x1d4   : > { %v465_v23 = vpop.f32.mrf.mxu1 }
 0x1d5   : > { %v466_v24 = vadd.f32 %v465_v23, %v394_v22 }
 0x1d6   : > { %v467_v25 = vpop.f32.mrf.mxu1 }
 0x1d7   : > { %v470_v26 = vmul.f32 0.5, %v466_v24  ;;  %v468_v27 = vadd.f32 %v467_v25, %v394_v22 }
 0x1d9   : > { %738 = vtanh.f32 %v470_v26  ;;  %v471_v28 = vmul.f32 0.5, %v468_v27 }
 0x1db   : > { %740 = vtanh.f32 %v471_v28 }
 0x1e6   : > { %v739_v29 = vpop.eup %738 }
 0x1e7   : > { %v474_v31 = vmul.f32 0.5, %v739_v29 }
 0x1e8   : > { %v741_v30 = vpop.eup %740 }
 0x1e9   : > { %v475_v32 = vmul.f32 0.5, %v741_v30  ;;  %v476_v34 = vadd.f32 0.5, %v474_v31 }
 0x1eb   : > { %v477_v33 = vadd.f32 0.5, %v475_v32 }
 0x1ed   : > { %518 = vmatprep.subr.mxu0 %v477_v33 }
 0x1ee   : > { %519 = vmatpush1.msra.mxu0 %v476_v34 }
 0x1ef   : > { %675 = vmatmul.mubr.msk.f32.vlgmr.msra.gmra.mxu0 %vm306_vm0, %v478_v35 }
 0x2af   : > { %v554_v37 = vpop.f32.mrf.mxu0 }
 0x2b0   : > { %v555_v38 = vadd.f32 %v554_v37, %v483_v36 }
 0x2b1   : > { %v556_v39 = vpop.f32.mrf.mxu0 }
 0x2b2   : > { %v559_v40 = vmul.f32 0.5, %v555_v38  ;;  %v557_v41 = vadd.f32 %v556_v39, %v483_v36 }
 0x2b4   : > { %742 = vtanh.f32 %v559_v40  ;;  %v560_v42 = vmul.f32 0.5, %v557_v41 }
 0x2b6   : > { %744 = vtanh.f32 %v560_v42 }
 0x2c1   : > { %v743_v43 = vpop.eup %742 }
 0x2c2   : > { %v563_v44 = vmul.f32 0.5, %v743_v43 }
 0x2c3   : > { %v745_v45 = vpop.eup %744 }
 0x2c4   : > { %v564_v46 = vmul.f32 0.5, %v745_v45  ;;  %v565_v47 = vadd.f32 0.5, %v563_v44 }
 0x2c6   : > { %v566_v48 = vadd.f32 0.5, %v564_v46 }
 0x2c8   : > { %v569_v49 = vcombine.low %v565_v47, %v566_v48 }
 0x2ca   : > { %676 = vst.sshfl [vmem:[%s294_s22] sm:$0x33 pattern:$0x76325410] %v569_v49 }
 0x2cb   : > { %787 = shalt.err (!%p784_p10)
}
 0x2cc   : > { %s788_s16 = scalar_lea.hbm %s592_s18, 64  ;;  %s792_s17 = scalar_lea.hbm %s1054_s7, 128 }
 0x2cd   : > { %p789_p2 = scmp.ne.s32.totalorder %s592_s18, %s788_s16  ;;  %p793_p7 = scmp.lt.s32.totalorder %s592_s18, %s1054_s7 }
 0x2ce   : > { %p794_p0 = scmp.lt.s32.totalorder %s792_s17, %s788_s16 }
 0x2cf   : > { %p790_p4 = pnand %p789_p2, %p1065_p12 }
 0x2d0   : > { %p795_p6 = por %p794_p0, %p793_p7 }
 0x2d1   : > { %p791_p9 = pneg %p790_p4 }
 0x2d3   : > { %p796_p11 = pnand %p795_p6, %p791_p9 }
 0x2d5   : > { %799 = shalt.err (!%p796_p11)
}
 0x2d6   : > { %686 = dma.vmem_to_hbm [thread:$0]  (%p1065_p12), %s595_s23, 64, %s592_s18, %s580_s15  }
 0x2d7 PF: > { %s606_s29 = sand.u32 1, %s826_s24   ;;  %p1066_p13 = scmp.ne.s32.totalorder %s1060_s14, 0 }
 0x2d8   : > { %p1067_p1 = scmp.ge.s32.totalorder %s838_s27, 2  ;;  %s607_s12 = scalar_lea.sflag [#allocation4], %s606_s29 }
 0x2da   : > { %p693_p3 = pnand %p1067_p1, %p1066_p13 }
 0x2dc   : > { %p694_p5 = pneg %p693_p3 }
 0x2de   : > { %821 = dma.done.wait (%p694_p5), %s607_s12, 64  }
 0x2df   : > { %823 = vsyncadd (%p694_p5), %s607_s12, 4294967232  ;;  %p20_p8 = scmp.ge.s32.totalorder %s909_s30, 4   ;;  %s1068_s24 = smov %s830_s25 }
 0x2e0   : > { %s1069_s25 = smov %s834_s26  ;;  %s1070_s26 = smov %s921_s10 }
 0x2e1   : > { %s1071_s27 = smov %s909_s30  ;;  %22 = sbr.rel (!%p20_p8) target bundleno = 5 (0x5), region = 93 }
 0x2e6   :  { %612 = vsyncpa [#allocation3], 1 }
 0x2e7   :  { %614 = vsyncpa [#allocation3 + $0x1], 1 }
 0x2e8   :  { %615 = vsyncpa [#allocation4], 1 }
 0x2e9   :  { %617 = vsyncpa [#allocation4 + $0x1], 1 }

</bundles_post_ra>
